<compile_context>
chip_gen: v7x
topology: tpu7x:2x2x1
jax: 0.10.0
libtpu: 0.0.40
codegen_flags: <defaults>
</compile_context>

<pallas_src>
import math

import jax
import jax.numpy as jnp
from jax.experimental import pallas as pl
from jax.experimental.pallas import tpu as pltpu

HID_DIM = 768
D = HID_DIM

_VMEM_LIMIT = 32 * 1024 * 1024   # scoped VMEM limit handed to Mosaic
_VMEM_BUDGET = 24 * 1024 * 1024  # tile-selection budget (headroom under limit)
_TL_CAP = 2048                   # lane-tile cap (multiple of 128)
# Divisors of 768 (all multiples of 8; the bf16-legal ones are multiples of 16).
_TD_CANDIDATES = (768, 384, 256, 192, 128, 96, 64, 32, 16, 8)


def make_pos_encoding(length: int, dtype=jnp.float32) -> jnp.ndarray:
    """Deterministic reconstruction of the PosEncoder buffer, shape (D, length)."""
    i = jnp.arange(D, dtype=jnp.float32)
    even = (i % 2) == 0
    freqs = jnp.where(even,
                      10000.0 ** (-i / D),
                      -(10000.0 ** ((1.0 - i) / D)))
    phases = jnp.where(even, 0.0, math.pi / 2.0)
    pos = jnp.arange(length, dtype=jnp.float32)[None, :]          # (1, L)
    pe = jnp.sin(pos * freqs[:, None] + phases[:, None])          # (D, L)
    return pe.astype(dtype)


def _pos_add_kernel(x_ref, pe_ref, o_ref):
    # All refs are (TD, TL) — the batch dim is squeezed out by the BlockSpec.
    o_ref[...] = x_ref[...] + pe_ref[...]


def _sublane(dtype) -> int:
    return {4: 8, 2: 16, 1: 32}[jnp.dtype(dtype).itemsize]


def _pick_tiles(L: int, dtype):
    """Choose (TD, TL, Lp). Lp == L means no padding copy is needed."""
    itemsize = jnp.dtype(dtype).itemsize
    sub = _sublane(dtype)

    def fits(td, tl):
        # x, pe and out blocks, each double-buffered by the Pallas pipeline.
        return 6 * td * tl * itemsize <= _VMEM_BUDGET

    def best_td(tl):
        for td in _TD_CANDIDATES:
            if td % sub == 0 and fits(td, tl):
                return td
        return None

    if L % 128 == 0:
        # Largest lane tile (multiple of 128) dividing L for which a channel
        # tile fits in the VMEM budget.
        for tl in range(min(L, _TL_CAP), 0, -128):
            if L % tl == 0:
                td = best_td(tl)
                if td is not None:
                    return td, tl, L
    else:
        # Full-extent lane block: legal (block dim == array dim), no HBM pad
        # copy; only the tail lane-group store is masked.
        td = best_td(L)
        if td is not None:
            return td, L, L
        # Fallback: pad L up to a multiple of 128 and tile.
        Lp = ((L + 127) // 128) * 128
        for tl in range(min(Lp, _TL_CAP), 0, -128):
            if Lp % tl == 0:
                td = best_td(tl)
                if td is not None:
                    return td, tl, Lp

    return sub, 128, ((L + 127) // 128) * 128   # conservative last resort


def pos_encoder(x: jnp.ndarray, pos_encoding: jnp.ndarray, *,
                in_place: bool = False) -> jnp.ndarray:
    """x: (B, D, L), pos_encoding: (D, L) -> (B, D, L) = x + pos_encoding."""
    B, d, L = x.shape
    assert d == D and pos_encoding.shape == (D, L)

    # Match dtypes once outside the kernel (no per-element promotion casts).
    pe = pos_encoding.astype(x.dtype)

    TD, TL, Lp = _pick_tiles(L, x.dtype)

    if Lp != L:
        x_in = jnp.pad(x, ((0, 0), (0, 0), (0, Lp - L)))
        pe_in = jnp.pad(pe, ((0, 0), (0, Lp - L)))
    else:
        x_in, pe_in = x, pe

    # Batch innermost (fastest-varying) -> pe block index constant across
    # consecutive grid steps, so its HBM->VMEM DMA is skipped on reuse.
    grid = (D // TD, Lp // TL, B)

    out = pl.pallas_call(
        _pos_add_kernel,
        out_shape=jax.ShapeDtypeStruct((B, D, Lp), x.dtype),
        grid_spec=pltpu.PrefetchScalarGridSpec(
            num_scalar_prefetch=0,
            grid=grid,
            in_specs=[
                pl.BlockSpec((pl.Squeezed(), TD, TL), lambda i, j, b: (b, i, j)),
                pl.BlockSpec((TD, TL), lambda i, j, b: (i, j)),
            ],
            out_specs=pl.BlockSpec((pl.Squeezed(), TD, TL),
                                   lambda i, j, b: (b, i, j)),
        ),
        compiler_params=pltpu.CompilerParams(
            dimension_semantics=("parallel", "parallel", "arbitrary"),
            vmem_limit_bytes=_VMEM_LIMIT,
        ),
        # Optional in-place update of x's HBM buffer (x is input index 0).
        input_output_aliases=({0: 0} if in_place else {}),
    )(x_in, pe_in)

    if Lp != L:
        out = out[:, :, :L]
    return out


if __name__ == "__main__":
    B = 2     # batch
    L = 128   # sequence length (the module's `length`); D is fixed at 768

    key = jax.random.PRNGKey(0)

    # Primary check: lane-aligned length (typical case, unmasked stores).
    x = jax.random.normal(key, (B, D, L), dtype=jnp.float32)
    pe = make_pos_encoding(L, dtype=jnp.float32)
    ref = x + pe[None, :, :]                       # plain-JAX reference
    out = jax.block_until_ready(pos_encoder(x, pe))
    assert out.shape == (B, D, L)
    assert jnp.allclose(out, ref, atol=1e-6, rtol=1e-6)

    # Secondary check: unaligned length exercises the no-pad full-extent path.
    L2 = 96
    x2 = jax.random.normal(jax.random.PRNGKey(1), (B, D, L2), dtype=jnp.float32)
    pe2 = make_pos_encoding(L2, dtype=jnp.float32)
    ref2 = x2 + pe2[None, :, :]
    out2 = jax.block_until_ready(pos_encoder(x2, pe2))
    assert out2.shape == (B, D, L2)
    assert jnp.allclose(out2, ref2, atol=1e-6, rtol=1e-6)

    print("KERNEL_OK")
</pallas_src>

<mosaic_0001>
module attributes {stable_mosaic.version = 11 : i64} {
  func.func @_pos_add_kernel(%arg0: i32, %arg1: i32, %arg2: i32, %arg3: memref<1x768x128xf32, #tpu.memory_space<vmem>>, %arg4: memref<768x128xf32, #tpu.memory_space<vmem>>, %arg5: memref<1x768x128xf32, #tpu.memory_space<vmem>>) attributes {dimension_semantics = [#tpu.dimension_semantics<parallel>, #tpu.dimension_semantics<parallel>, #tpu.dimension_semantics<arbitrary>], iteration_bounds = array<i64: 1, 1, 2>, scalar_prefetch = 0 : i64, scratch_operands = 0 : i64, tpu.core_type = #tpu.core_type<tc>, window_params = [{transform_indices = @transform_0, window_bounds = array<i64: 1, 768, 128>}, {transform_indices = @transform_1, window_bounds = array<i64: 768, 128>}, {transform_indices = @transform_2, window_bounds = array<i64: 1, 768, 128>}]} {
    %c0 = arith.constant 0 : index
    %c0_0 = arith.constant 0 : index
    %c0_1 = arith.constant 0 : index
    %0 = vector.load %arg3[%c0, %c0_0, %c0_1] : memref<1x768x128xf32, #tpu.memory_space<vmem>>, vector<1x768x128xf32>
    %1 = vector.shape_cast %0 : vector<1x768x128xf32> to vector<768x128xf32>
    %c0_2 = arith.constant 0 : index
    %c0_3 = arith.constant 0 : index
    %2 = vector.load %arg4[%c0_2, %c0_3] : memref<768x128xf32, #tpu.memory_space<vmem>>, vector<768x128xf32>
    %3 = arith.addf %1, %2 : vector<768x128xf32>
    %c0_4 = arith.constant 0 : index
    %c0_5 = arith.constant 0 : index
    %c0_6 = arith.constant 0 : index
    %4 = vector.load %arg5[%c0_4, %c0_5, %c0_6] : memref<1x768x128xf32, #tpu.memory_space<vmem>>, vector<1x768x128xf32>
    %5 = vector.shape_cast %4 : vector<1x768x128xf32> to vector<768x128xf32>
    %6 = vector.shape_cast %3 : vector<768x128xf32> to vector<1x768x128xf32>
    tpu.vector_store %arg5[%c0_4, %c0_5, %c0_6], %6 {strides = array<i32>} : memref<1x768x128xf32, #tpu.memory_space<vmem>>, vector<1x768x128xf32>,
    return
  }
  func.func @transform_0(%arg0: i32, %arg1: i32, %arg2: i32) -> (i32, i32, i32) {
    %c0_i32 = arith.constant 0 : i32
    return %arg2, %arg0, %arg1 : i32, i32, i32
  }
  func.func @transform_1(%arg0: i32, %arg1: i32, %arg2: i32) -> (i32, i32) {
    %c0_i32 = arith.constant 0 : i32
    return %arg0, %arg1 : i32, i32
  }
  func.func @transform_2(%arg0: i32, %arg1: i32, %arg2: i32) -> (i32, i32, i32) {
    %c0_i32 = arith.constant 0 : i32
    return %arg2, %arg0, %arg1 : i32, i32, i32
  }
}

</mosaic_0001>

<bundles_post_ra>
// kernel: tpu_custom_call.1
= control target key start
LH: loop header
LB: loop body
LE: loop exit
PB: predicated region body
PF: predicated region fallthrough
CT: control target
= control target key end

     0   :  { %7 = vsyncpa [#allocation3], 0  ;;  %s1404_s0 = inlined_call_operand.hbm [shape: f32[2,768,128], index: 0, kind: input, shape index: {}]   ;;  %s1405_s1 = inlined_call_operand.hbm [shape: f32[768,128], index: 1, kind: input, shape index: {}]   ;;  %s1406_s2 = inlined_call_operand.hbm [shape: f32[2,768,128], index: 2, kind: output, shape index: {}]  }
   0x1   :  { %9 = vsyncpa [#allocation3 + $0x1], 0 }
   0x2   :  { %10 = vsyncpa [#allocation6], 0 }
   0x3   :  { %11 = vsyncpa [#allocation4], 0 }
   0x4   :  { %13 = vsyncpa [#allocation4 + $0x1], 0  ;;  %s988_s9 = smov 0   ;;  %s990_s10 = smov 0  }
   0x5   :  { %s992_s11 = smov 0   ;;  %s994_s12 = smov 0  }
   0x6   :  { %s996_s13 = smov 0   ;;  %s998_s14 = smov 0  }
   0x7 LB: > { %s728_s15 = sadd.s32 4294967295, %s964_s14   ;;  %s729_s16 = sadd.s32 4294967294, %s964_s14   ;;  %s964_s14 = sphi %s998_s14, %s19_s14   ;;  %s960_s13 = sphi %s996_s13, %s1429_s13   ;;  %s956_s12 = sphi %s994_s12, %s1428_s12   ;;  %s952_s11 = sphi %s992_s11, %s1427_s11   ;;  %s948_s10 = sphi %s990_s10, %s1426_s10   ;;  %s944_s9 = sphi %s988_s9, %s1425_s9  }
   0x8   : > { %p62_p0 = scmp.ne.s32.totalorder %s948_s10, %s944_s9  ;;  %p1022_p1 = scmp.eq.s32.totalorder %s728_s15, 0 }
   0x9   : > { %p1026_p2 = scmp.eq.s32.totalorder %s728_s15, 1  ;;  %p124_p3 = scmp.eq.s32.totalorder %s729_s16, 1 }
   0xa   : > { %s1411_s17 = scalar_select %p1022_p1, 1, 0 }
   0xb   : > { %s1412_s18 = scalar_select %p1026_p2, 1, 0 }
   0xc   : > { %p1032_p4 = por %p1022_p1, %p62_p0  ;;  %p730_p5 = scmp.ge.s32.totalorder %s964_s14, 1 }
   0xd   : > { %p1037_p6 = por %p124_p3, %p62_p0  ;;  %p131_p7 = scmp.lt.s32.totalorder %s964_s14, 3 }
   0xe   : > { %s1413_s19 = scalar_select %p1032_p4, 1, 0 }
   0xf   : > { %s1414_s20 = scalar_select %p1037_p6, 1, 0 }
  0x10   : > { %p1042_p8 = pnand %p730_p5, %p131_p7  ;;  %s966_s22 = smov [#allocation5]  }
  0x11   : > { %s147_s23 = sshll.u32 %s966_s22, 4  ;;  %s31_s25 = sadd.s32 1, %s960_s13  ;;  %s148_s23 = int_to_ptr.vmem [resolvable:$true] %s147_s23 }
  0x12   : > { %s1415_s21 = scalar_select %p1042_p8, 1, 0 }
  0x13   : > { %p751_p9 = pneg %p1042_p8  ;;  %s820_s28 = scalar_lea.hbm %s1405_s1, 12288 }
  0x14   : > { %p821_p12 = scmp.ne.s32.totalorder %s1405_s1, %s820_s28  ;;  %p827_p5 = scmp.lt.u32.totalorder %s820_s28, %s1405_s1 }
  0x15   : > { %p1051_p11 = pnand %p751_p9, %p1022_p1 }
  0x17   : > { %p822_p13 = pneg %p1051_p11 }
  0x19   : > { %p823_p0 = pnand %p822_p13, %p821_p12 }
  0x1b   : > { %p824_p3 = pneg %p823_p0 }
  0x1d   : > { %p829_p7 = pnand %p827_p5, %p824_p3 }
  0x1f   : > { %832 = shalt.err (!%p829_p7)
}
  0x20   : > { %s833_s5 = scalar_lea.vmem %s148_s23, 12288  ;;  %p841_p1 = scmp.lt.s32.totalorder %s148_s23, %s148_s23 }
  0x21   : > { %p834_p9 = scmp.ne.s32.totalorder %s148_s23, %s833_s5  ;;  %p842_p4 = scmp.lt.s32.totalorder %s833_s5, %s833_s5 }
  0x23   : > { %p836_p10 = pnand %p834_p9, %p822_p13  ;;  %p843_p8 = por %p842_p4, %p841_p1 }
  0x25   : > { %p837_p6 = pneg %p836_p10 }
  0x27   : > { %p844_p2 = pnand %p843_p8, %p837_p6 }
  0x29   : > { %847 = shalt.err (!%p844_p2)
}
  0x2a   : > { %s967_s6 = smov 128   ;;  %s968_s7 = smov 8  }
  0x2b   : > { %754 = dma.hbm_to_vmem [thread:$0]  (!%p1051_p11), %s1405_s1, 12288, %s148_s23, [#allocation6], %s967_s6, %s967_s6, %s968_s7  }
  0x2c   : > { %p32_p1 = scmp.ge.s32.totalorder %s31_s25, 2  ;;  %s49_s16 = sadd.s32 1, %s952_s11 }
  0x2d   : > { %p56_p2 = scmp.ne.s32.totalorder %s952_s11, %s948_s10  ;;  %p57_p4 = scmp.eq.s32.totalorder %s964_s14, 0 }
  0x2e   : > { %s1431_s25 = smov (%p32_p1, %s31_s25), 0  ;;  %p1417_p8 = scmp.ne.s32.totalorder %s1412_s18, 0 }
  0x2f   : > { %p58_p6 = por %p57_p4, %p56_p2  ;;  %s42_s24 = ssub.s32 %s960_s13, %s1431_s25 }
  0x30   : > { %p1083_p10 = por %p1417_p8, %p56_p2  ;;  %p764_p12 = scmp.lt.s32.totalorder %s964_s14, 2 }
  0x31   : > { %p47_p13 = scmp.eq.s32.totalorder %s42_s24, 0  ;;  %s161_s26 = sand.u32 1, %s952_s11  }
  0x32   : > { %s739_s27 = smul.u32 768, %s161_s26  ;;  %p1095_p11 = pnand %p764_p12, %p58_p6 }
  0x33   : > { %s1092_s28 = scalar_select %p47_p13, %s952_s11, %s49_s16  }
  0x34   : > { %s740_s23 = smul.u32 12288, %s960_s13  ;;  %s165_s29 = scalar_lea.vmem [#allocation2], %s739_s27 }
  0x35   : > { %s175_s30 = sshll.u32 %s165_s29, 4  ;;  %s1106_s8 = scalar_lea.sflag [#allocation3], %s161_s26  ;;  %s1104_s30 = int_to_ptr.vmem [resolvable:$true] %s175_s30 }
  0x36   : > { %s1102_s5 = scalar_lea.hbm %s1404_s0, %s740_s23  ;;  %p850_p3 = pneg %p1095_p11 }
  0x37   : > { %s848_s15 = scalar_lea.hbm %s1102_s5, 12288  ;;  %s853_s27 = scalar_lea.hbm %s1404_s0, 24576 }
  0x38   : > { %p849_p0 = scmp.ne.s32.totalorder %s1102_s5, %s848_s15  ;;  %p854_p9 = scmp.lt.u32.totalorder %s1102_s5, %s1404_s0 }
  0x39   : > { %p855_p1 = scmp.lt.u32.totalorder %s853_s27, %s848_s15  ;;  %p857_p4 = scmp.lt.u32.totalorder %s848_s15, %s1102_s5 }
  0x3a   : > { %p851_p5 = pnand %p850_p3, %p849_p0 }
  0x3b   : > { %p856_p2 = por %p855_p1, %p854_p9 }
  0x3c   : > { %p852_p7 = pneg %p851_p5 }
  0x3d   : > { %p858_p6 = por %p857_p4, %p856_p2 }
  0x3f   : > { %p859_p8 = pnand %p858_p6, %p852_p7 }
  0x41   : > { %862 = shalt.err (!%p859_p8)
}
  0x42   : > { %s863_s26 = scalar_lea.vmem %s1104_s30, 12288  ;;  %s969_s4 = smov [#allocation2]  }
  0x43   : > { %p864_p12 = scmp.ne.s32.totalorder %s1104_s30, %s863_s26  ;;  %s868_s18 = sshll.u32 %s969_s4, 4  ;;  %s869_s18 = int_to_ptr.vmem [resolvable:$false] %s868_s18 }
  0x44   : > { %s870_s16 = scalar_lea.vmem %s869_s18, 24576  ;;  %p871_p5 = scmp.lt.s32.totalorder %s1104_s30, %s869_s18 }
  0x45   : > { %p866_p13 = pnand %p864_p12, %p850_p3  ;;  %p872_p9 = scmp.lt.s32.totalorder %s870_s16, %s863_s26 }
  0x47   : > { %p867_p0 = pneg %p866_p13  ;;  %p873_p1 = por %p872_p9, %p871_p5 }
  0x49   : > { %p874_p2 = pnand %p873_p1, %p867_p0 }
  0x4b   : > { %877 = shalt.err (!%p874_p2)
}
  0x4c   : > { %758 = dma.hbm_to_vmem [thread:$0]  (!%p1095_p11), %s1102_s5, 12288, %s1104_s30, %s1106_s8, %s967_s6, %s967_s6, %s968_s7  }
  0x4d   : > { %p1420_p3 = scmp.ne.s32.totalorder %s1415_s21, 0 }
  0x4e   : > { %s1140_s15 = sand.u32 (!%p1420_p3), 1, %s948_s10   ;;  %p1421_p7 = scmp.ne.s32.totalorder (!%p1420_p3), %s1413_s19, 0 }
  0x4f   : > { %187 = sbr.rel (%p1420_p3) target bundleno = 182 (0xb6), region = 28  ;;  %s190_s27 = scalar_lea.sflag (!%p1420_p3), [#allocation3], %s1140_s15 }
  0x50   : > { %s741_s24 = smul.u32 (!%p1420_p3), 768, %s1140_s15 }
  0x52   : > { %s1144_s23 = scalar_lea.vmem (!%p1420_p3), [#allocation2], %s741_s24 }
  0x56   : > { %931 = dma.done.wait (%p1421_p7), %s190_s27, 12288  }
  0x57   : > { %933 = vsyncadd (%p1421_p7), %s190_s27, 4294955008  ;;  %p1422_p11 = scmp.ne.s32.totalorder %s1411_s17, 0 }
  0x59   : > { %935 = dma.done.wait (%p1422_p11), [#allocation6], 12288  }
  0x5a   : > { %937 = vsyncadd (%p1422_p11), [#allocation6], 4294955008  ;;  %v221_v0 = vld [vmem:[%s1144_s23] sm:$0xff]  ;;  %v222_v2 = vld [vmem:[%s1144_s23 + $0x8] sm:$0xff]  ;;  %s1159_s17 = scalar_lea.vmem [#allocation7], %s741_s24  ;;  %s742_s19 = smul.u32 12288, %s956_s12 }
  0x5b   : > { %v317_v1 = vld [vmem:[#allocation5] sm:$0xff]  ;;  %v318_v4 = vld [vmem:[#allocation5 + $0x8] sm:$0xff]  ;;  %v223_v5 = vld [vmem:[%s1144_s23 + $0x10] sm:$0xff]  ;;  %s622_s21 = sshll.u32 %s1159_s17, 4  ;;  %s606_s30 = scalar_lea.sflag [#allocation4], %s1140_s15  ;;  %s1345_s21 = int_to_ptr.vmem [resolvable:$true] %s622_s21 }
  0x5c   : > { %v413_v3 = vadd.f32 %v317_v1, %v221_v0  ;;  %v319_v6 = vld [vmem:[#allocation5 + $0x10] sm:$0xff]  ;;  %v414_v7 = vadd.f32 %v318_v4, %v222_v2  ;;  %v224_v9 = vld [vmem:[%s1144_s23 + $0x18] sm:$0xff]  ;;  %v225_v11 = vld [vmem:[%s1144_s23 + $0x20] sm:$0xff]  ;;  %s1352_s7 = scalar_lea.hbm %s1406_s2, %s742_s19  ;;  %s878_s3 = scalar_lea.vmem %s1345_s21, 12288 }
  0x5d   : > { %v415_v8 = vadd.f32 %v319_v6, %v223_v5  ;;  %v320_v10 = vld [vmem:[#allocation5 + $0x18] sm:$0xff]  ;;  %v321_v13 = vld [vmem:[#allocation5 + $0x20] sm:$0xff]  ;;  %v226_v14 = vld [vmem:[%s1144_s23 + $0x28] sm:$0xff]  ;;  %p879_p4 = scmp.ne.s32.totalorder %s1345_s21, %s878_s3  ;;  %s970_s5 = smov [#allocation7]  }
  0x5e   : > { %509 = vst [vmem:[%s1159_s17] sm:$0xff] %v413_v3  ;;  %v416_v12 = vadd.f32 %v320_v10, %v224_v9  ;;  %v322_v15 = vld [vmem:[#allocation5 + $0x28] sm:$0xff]  ;;  %510 = vst [vmem:[%s1159_s17 + $0x8] sm:$0xff] %v414_v7  ;;  %v417_v16 = vadd.f32 %v321_v13, %v225_v11  ;;  %v227_v18 = vld [vmem:[%s1144_s23 + $0x30] sm:$0xff]  ;;  %s882_s8 = sshll.u32 %s970_s5, 4  ;;  %s883_s8 = int_to_ptr.vmem [resolvable:$false] %s882_s8 }
  0x5f   : > { %511 = vst [vmem:[%s1159_s17 + $0x10] sm:$0xff] %v415_v8  ;;  %v418_v17 = vadd.f32 %v322_v15, %v226_v14  ;;  %v323_v19 = vld [vmem:[#allocation5 + $0x30] sm:$0xff]  ;;  %v228_v20 = vld [vmem:[%s1144_s23 + $0x38] sm:$0xff]  ;;  %v229_v23 = vld [vmem:[%s1144_s23 + $0x40] sm:$0xff]  ;;  %p880_p6 = pnand %p879_p4, %p1083_p10  ;;  %s884_s29 = scalar_lea.vmem %s883_s8, 24576 }
  0x60   : > { %512 = vst [vmem:[%s1159_s17 + $0x18] sm:$0xff] %v416_v12  ;;  %v419_v21 = vadd.f32 %v323_v19, %v227_v18  ;;  %v324_v22 = vld [vmem:[#allocation5 + $0x38] sm:$0xff]  ;;  %v325_v24 = vld [vmem:[#allocation5 + $0x40] sm:$0xff]  ;;  %513 = vst [vmem:[%s1159_s17 + $0x20] sm:$0xff] %v417_v16  ;;  %p885_p12 = scmp.lt.s32.totalorder %s1345_s21, %s883_s8  ;;  %p886_p13 = scmp.lt.s32.totalorder %s884_s29, %s878_s3 }
  0x61   : > { %514 = vst [vmem:[%s1159_s17 + $0x28] sm:$0xff] %v418_v17  ;;  %v420_v25 = vadd.f32 %v324_v22, %v228_v20  ;;  %v421_v26 = vadd.f32 %v325_v24, %v229_v23  ;;  %v230_v27 = vld [vmem:[%s1144_s23 + $0x48] sm:$0xff]  ;;  %v231_v29 = vld [vmem:[%s1144_s23 + $0x50] sm:$0xff]  ;;  %v232_v32 = vld [vmem:[%s1144_s23 + $0x58] sm:$0xff]  ;;  %p881_p8 = pneg %p880_p6 }
  0x62   : > { %v326_v28 = vld [vmem:[#allocation5 + $0x48] sm:$0xff]  ;;  %515 = vst [vmem:[%s1159_s17 + $0x30] sm:$0xff] %v419_v21  ;;  %v327_v31 = vld [vmem:[#allocation5 + $0x50] sm:$0xff]  ;;  %v328_v33 = vld [vmem:[#allocation5 + $0x58] sm:$0xff]  ;;  %p887_p0 = por %p886_p13, %p885_p12 }
  0x63   : > { %v422_v30 = vadd.f32 %v326_v28, %v230_v27  ;;  %516 = vst [vmem:[%s1159_s17 + $0x38] sm:$0xff] %v420_v25  ;;  %517 = vst [vmem:[%s1159_s17 + $0x40] sm:$0xff] %v421_v26  ;;  %v423_v34 = vadd.f32 %v327_v31, %v231_v29  ;;  %v424_v35 = vadd.f32 %v328_v33, %v232_v32  ;;  %v233_v36 = vld [vmem:[%s1144_s23 + $0x60] sm:$0xff]  ;;  %v234_v38 = vld [vmem:[%s1144_s23 + $0x68] sm:$0xff] }
  0x64   : > { %v329_v37 = vld [vmem:[#allocation5 + $0x60] sm:$0xff]  ;;  %v330_v40 = vld [vmem:[#allocation5 + $0x68] sm:$0xff]  ;;  %v235_v41 = vld [vmem:[%s1144_s23 + $0x70] sm:$0xff]  ;;  %p888_p5 = pnand %p887_p0, %p881_p8 }
  0x65   : > { %518 = vst [vmem:[%s1159_s17 + $0x48] sm:$0xff] %v422_v30  ;;  %v425_v39 = vadd.f32 %v329_v37, %v233_v36  ;;  %v331_v42 = vld [vmem:[#allocation5 + $0x70] sm:$0xff]  ;;  %519 = vst [vmem:[%s1159_s17 + $0x50] sm:$0xff] %v423_v34  ;;  %v426_v43 = vadd.f32 %v330_v40, %v234_v38  ;;  %v236_v45 = vld [vmem:[%s1144_s23 + $0x78] sm:$0xff] }
  0x66   : > { %520 = vst [vmem:[%s1159_s17 + $0x58] sm:$0xff] %v424_v35  ;;  %v427_v44 = vadd.f32 %v331_v42, %v235_v41  ;;  %v332_v46 = vld [vmem:[#allocation5 + $0x78] sm:$0xff]  ;;  %v237_v47 = vld [vmem:[%s1144_s23 + $0x80] sm:$0xff]  ;;  %v238_v50 = vld [vmem:[%s1144_s23 + $0x88] sm:$0xff] }
  0x67   : > { %521 = vst [vmem:[%s1159_s17 + $0x60] sm:$0xff] %v425_v39  ;;  %v428_v48 = vadd.f32 %v332_v46, %v236_v45  ;;  %v333_v49 = vld [vmem:[#allocation5 + $0x80] sm:$0xff]  ;;  %v334_v51 = vld [vmem:[#allocation5 + $0x88] sm:$0xff]  ;;  %522 = vst [vmem:[%s1159_s17 + $0x68] sm:$0xff] %v426_v43 }
  0x68   : > { %523 = vst [vmem:[%s1159_s17 + $0x70] sm:$0xff] %v427_v44  ;;  %v429_v52 = vadd.f32 %v333_v49, %v237_v47  ;;  %v430_v53 = vadd.f32 %v334_v51, %v238_v50  ;;  %v239_v54 = vld [vmem:[%s1144_s23 + $0x90] sm:$0xff]  ;;  %v240_v56 = vld [vmem:[%s1144_s23 + $0x98] sm:$0xff]  ;;  %v241_v59 = vld [vmem:[%s1144_s23 + $0xa0] sm:$0xff] }
  0x69   : > { %v335_v55 = vld [vmem:[#allocation5 + $0x90] sm:$0xff]  ;;  %524 = vst [vmem:[%s1159_s17 + $0x78] sm:$0xff] %v428_v48  ;;  %v336_v58 = vld [vmem:[#allocation5 + $0x98] sm:$0xff]  ;;  %v337_v60 = vld [vmem:[#allocation5 + $0xa0] sm:$0xff] }
  0x6a   : > { %v431_v57 = vadd.f32 %v335_v55, %v239_v54  ;;  %525 = vst [vmem:[%s1159_s17 + $0x80] sm:$0xff] %v429_v52  ;;  %526 = vst [vmem:[%s1159_s17 + $0x88] sm:$0xff] %v430_v53  ;;  %v432_v61 = vadd.f32 %v336_v58, %v240_v56  ;;  %v433_v62 = vadd.f32 %v337_v60, %v241_v59  ;;  %v242_v63 = vld [vmem:[%s1144_s23 + $0xa8] sm:$0xff]  ;;  %v243_v1 = vld [vmem:[%s1144_s23 + $0xb0] sm:$0xff] }
  0x6b   : > { %v338_v0 = vld [vmem:[#allocation5 + $0xa8] sm:$0xff]  ;;  %v339_v3 = vld [vmem:[#allocation5 + $0xb0] sm:$0xff]  ;;  %v244_v4 = vld [vmem:[%s1144_s23 + $0xb8] sm:$0xff] }
  0x6c   : > { %527 = vst [vmem:[%s1159_s17 + $0x90] sm:$0xff] %v431_v57  ;;  %v434_v2 = vadd.f32 %v338_v0, %v242_v63  ;;  %v340_v5 = vld [vmem:[#allocation5 + $0xb8] sm:$0xff]  ;;  %528 = vst [vmem:[%s1159_s17 + $0x98] sm:$0xff] %v432_v61  ;;  %v435_v6 = vadd.f32 %v339_v3, %v243_v1  ;;  %v245_v8 = vld [vmem:[%s1144_s23 + $0xc0] sm:$0xff] }
  0x6d   : > { %529 = vst [vmem:[%s1159_s17 + $0xa0] sm:$0xff] %v433_v62  ;;  %v436_v7 = vadd.f32 %v340_v5, %v244_v4  ;;  %v341_v9 = vld [vmem:[#allocation5 + $0xc0] sm:$0xff]  ;;  %v246_v10 = vld [vmem:[%s1144_s23 + $0xc8] sm:$0xff]  ;;  %v247_v13 = vld [vmem:[%s1144_s23 + $0xd0] sm:$0xff] }
  0x6e   : > { %530 = vst [vmem:[%s1159_s17 + $0xa8] sm:$0xff] %v434_v2  ;;  %v437_v11 = vadd.f32 %v341_v9, %v245_v8  ;;  %v342_v12 = vld [vmem:[#allocation5 + $0xc8] sm:$0xff]  ;;  %v343_v14 = vld [vmem:[#allocation5 + $0xd0] sm:$0xff]  ;;  %531 = vst [vmem:[%s1159_s17 + $0xb0] sm:$0xff] %v435_v6 }
  0x6f   : > { %532 = vst [vmem:[%s1159_s17 + $0xb8] sm:$0xff] %v436_v7  ;;  %v438_v15 = vadd.f32 %v342_v12, %v246_v10  ;;  %v439_v16 = vadd.f32 %v343_v14, %v247_v13  ;;  %v248_v17 = vld [vmem:[%s1144_s23 + $0xd8] sm:$0xff]  ;;  %v249_v19 = vld [vmem:[%s1144_s23 + $0xe0] sm:$0xff]  ;;  %v250_v22 = vld [vmem:[%s1144_s23 + $0xe8] sm:$0xff] }
  0x70   : > { %v344_v18 = vld [vmem:[#allocation5 + $0xd8] sm:$0xff]  ;;  %533 = vst [vmem:[%s1159_s17 + $0xc0] sm:$0xff] %v437_v11  ;;  %v345_v21 = vld [vmem:[#allocation5 + $0xe0] sm:$0xff]  ;;  %v346_v23 = vld [vmem:[#allocation5 + $0xe8] sm:$0xff] }
  0x71   : > { %v440_v20 = vadd.f32 %v344_v18, %v248_v17  ;;  %534 = vst [vmem:[%s1159_s17 + $0xc8] sm:$0xff] %v438_v15  ;;  %535 = vst [vmem:[%s1159_s17 + $0xd0] sm:$0xff] %v439_v16  ;;  %v441_v24 = vadd.f32 %v345_v21, %v249_v19  ;;  %v442_v25 = vadd.f32 %v346_v23, %v250_v22  ;;  %v251_v26 = vld [vmem:[%s1144_s23 + $0xf0] sm:$0xff]  ;;  %v252_v28 = vld [vmem:[%s1144_s23 + $0xf8] sm:$0xff] }
  0x72   : > { %v347_v27 = vld [vmem:[#allocation5 + $0xf0] sm:$0xff]  ;;  %v348_v30 = vld [vmem:[#allocation5 + $0xf8] sm:$0xff]  ;;  %v253_v31 = vld [vmem:[%s1144_s23 + $0x100] sm:$0xff] }
  0x73   : > { %536 = vst [vmem:[%s1159_s17 + $0xd8] sm:$0xff] %v440_v20  ;;  %v443_v29 = vadd.f32 %v347_v27, %v251_v26  ;;  %v349_v32 = vld [vmem:[#allocation5 + $0x100] sm:$0xff]  ;;  %537 = vst [vmem:[%s1159_s17 + $0xe0] sm:$0xff] %v441_v24  ;;  %v444_v33 = vadd.f32 %v348_v30, %v252_v28  ;;  %v254_v35 = vld [vmem:[%s1144_s23 + $0x108] sm:$0xff] }
  0x74   : > { %538 = vst [vmem:[%s1159_s17 + $0xe8] sm:$0xff] %v442_v25  ;;  %v445_v34 = vadd.f32 %v349_v32, %v253_v31  ;;  %v350_v36 = vld [vmem:[#allocation5 + $0x108] sm:$0xff]  ;;  %v255_v37 = vld [vmem:[%s1144_s23 + $0x110] sm:$0xff]  ;;  %v256_v40 = vld [vmem:[%s1144_s23 + $0x118] sm:$0xff] }
  0x75   : > { %539 = vst [vmem:[%s1159_s17 + $0xf0] sm:$0xff] %v443_v29  ;;  %v446_v38 = vadd.f32 %v350_v36, %v254_v35  ;;  %v351_v39 = vld [vmem:[#allocation5 + $0x110] sm:$0xff]  ;;  %v352_v41 = vld [vmem:[#allocation5 + $0x118] sm:$0xff]  ;;  %540 = vst [vmem:[%s1159_s17 + $0xf8] sm:$0xff] %v444_v33 }
  0x76   : > { %541 = vst [vmem:[%s1159_s17 + $0x100] sm:$0xff] %v445_v34  ;;  %v447_v42 = vadd.f32 %v351_v39, %v255_v37  ;;  %v448_v43 = vadd.f32 %v352_v41, %v256_v40  ;;  %v257_v44 = vld [vmem:[%s1144_s23 + $0x120] sm:$0xff]  ;;  %v258_v46 = vld [vmem:[%s1144_s23 + $0x128] sm:$0xff]  ;;  %v259_v49 = vld [vmem:[%s1144_s23 + $0x130] sm:$0xff] }
  0x77   : > { %v353_v45 = vld [vmem:[#allocation5 + $0x120] sm:$0xff]  ;;  %542 = vst [vmem:[%s1159_s17 + $0x108] sm:$0xff] %v446_v38  ;;  %v354_v48 = vld [vmem:[#allocation5 + $0x128] sm:$0xff]  ;;  %v355_v50 = vld [vmem:[#allocation5 + $0x130] sm:$0xff] }
  0x78   : > { %v449_v47 = vadd.f32 %v353_v45, %v257_v44  ;;  %543 = vst [vmem:[%s1159_s17 + $0x110] sm:$0xff] %v447_v42  ;;  %544 = vst [vmem:[%s1159_s17 + $0x118] sm:$0xff] %v448_v43  ;;  %v450_v51 = vadd.f32 %v354_v48, %v258_v46  ;;  %v451_v52 = vadd.f32 %v355_v50, %v259_v49  ;;  %v260_v53 = vld [vmem:[%s1144_s23 + $0x138] sm:$0xff]  ;;  %v261_v55 = vld [vmem:[%s1144_s23 + $0x140] sm:$0xff] }
  0x79   : > { %v356_v54 = vld [vmem:[#allocation5 + $0x138] sm:$0xff]  ;;  %v357_v57 = vld [vmem:[#allocation5 + $0x140] sm:$0xff]  ;;  %v262_v58 = vld [vmem:[%s1144_s23 + $0x148] sm:$0xff] }
  0x7a   : > { %545 = vst [vmem:[%s1159_s17 + $0x120] sm:$0xff] %v449_v47  ;;  %v452_v56 = vadd.f32 %v356_v54, %v260_v53  ;;  %v358_v59 = vld [vmem:[#allocation5 + $0x148] sm:$0xff]  ;;  %546 = vst [vmem:[%s1159_s17 + $0x128] sm:$0xff] %v450_v51  ;;  %v453_v60 = vadd.f32 %v357_v57, %v261_v55  ;;  %v263_v62 = vld [vmem:[%s1144_s23 + $0x150] sm:$0xff] }
  0x7b   : > { %547 = vst [vmem:[%s1159_s17 + $0x130] sm:$0xff] %v451_v52  ;;  %v454_v61 = vadd.f32 %v358_v59, %v262_v58  ;;  %v359_v63 = vld [vmem:[#allocation5 + $0x150] sm:$0xff]  ;;  %v264_v0 = vld [vmem:[%s1144_s23 + $0x158] sm:$0xff]  ;;  %v265_v3 = vld [vmem:[%s1144_s23 + $0x160] sm:$0xff] }
  0x7c   : > { %548 = vst [vmem:[%s1159_s17 + $0x138] sm:$0xff] %v452_v56  ;;  %v455_v1 = vadd.f32 %v359_v63, %v263_v62  ;;  %v360_v2 = vld [vmem:[#allocation5 + $0x158] sm:$0xff]  ;;  %v361_v4 = vld [vmem:[#allocation5 + $0x160] sm:$0xff]  ;;  %549 = vst [vmem:[%s1159_s17 + $0x140] sm:$0xff] %v453_v60 }
  0x7d   : > { %550 = vst [vmem:[%s1159_s17 + $0x148] sm:$0xff] %v454_v61  ;;  %v456_v5 = vadd.f32 %v360_v2, %v264_v0  ;;  %v457_v6 = vadd.f32 %v361_v4, %v265_v3  ;;  %v266_v7 = vld [vmem:[%s1144_s23 + $0x168] sm:$0xff]  ;;  %v267_v9 = vld [vmem:[%s1144_s23 + $0x170] sm:$0xff]  ;;  %v268_v12 = vld [vmem:[%s1144_s23 + $0x178] sm:$0xff] }
  0x7e   : > { %v362_v8 = vld [vmem:[#allocation5 + $0x168] sm:$0xff]  ;;  %551 = vst [vmem:[%s1159_s17 + $0x150] sm:$0xff] %v455_v1  ;;  %v363_v11 = vld [vmem:[#allocation5 + $0x170] sm:$0xff]  ;;  %v364_v13 = vld [vmem:[#allocation5 + $0x178] sm:$0xff] }
  0x7f   : > { %v458_v10 = vadd.f32 %v362_v8, %v266_v7  ;;  %552 = vst [vmem:[%s1159_s17 + $0x158] sm:$0xff] %v456_v5  ;;  %553 = vst [vmem:[%s1159_s17 + $0x160] sm:$0xff] %v457_v6  ;;  %v459_v14 = vadd.f32 %v363_v11, %v267_v9  ;;  %v460_v15 = vadd.f32 %v364_v13, %v268_v12  ;;  %v269_v16 = vld [vmem:[%s1144_s23 + $0x180] sm:$0xff]  ;;  %v270_v18 = vld [vmem:[%s1144_s23 + $0x188] sm:$0xff] }
  0x80   : > { %v365_v17 = vld [vmem:[#allocation5 + $0x180] sm:$0xff]  ;;  %v366_v20 = vld [vmem:[#allocation5 + $0x188] sm:$0xff]  ;;  %v271_v21 = vld [vmem:[%s1144_s23 + $0x190] sm:$0xff] }
  0x81   : > { %554 = vst [vmem:[%s1159_s17 + $0x168] sm:$0xff] %v458_v10  ;;  %v461_v19 = vadd.f32 %v365_v17, %v269_v16  ;;  %v367_v22 = vld [vmem:[#allocation5 + $0x190] sm:$0xff]  ;;  %555 = vst [vmem:[%s1159_s17 + $0x170] sm:$0xff] %v459_v14  ;;  %v462_v23 = vadd.f32 %v366_v20, %v270_v18  ;;  %v272_v25 = vld [vmem:[%s1144_s23 + $0x198] sm:$0xff] }
  0x82   : > { %556 = vst [vmem:[%s1159_s17 + $0x178] sm:$0xff] %v460_v15  ;;  %v463_v24 = vadd.f32 %v367_v22, %v271_v21  ;;  %v368_v26 = vld [vmem:[#allocation5 + $0x198] sm:$0xff]  ;;  %v273_v27 = vld [vmem:[%s1144_s23 + $0x1a0] sm:$0xff]  ;;  %v274_v30 = vld [vmem:[%s1144_s23 + $0x1a8] sm:$0xff] }
  0x83   : > { %557 = vst [vmem:[%s1159_s17 + $0x180] sm:$0xff] %v461_v19  ;;  %v464_v28 = vadd.f32 %v368_v26, %v272_v25  ;;  %v369_v29 = vld [vmem:[#allocation5 + $0x1a0] sm:$0xff]  ;;  %v370_v31 = vld [vmem:[#allocation5 + $0x1a8] sm:$0xff]  ;;  %558 = vst [vmem:[%s1159_s17 + $0x188] sm:$0xff] %v462_v23 }
  0x84   : > { %559 = vst [vmem:[%s1159_s17 + $0x190] sm:$0xff] %v463_v24  ;;  %v465_v32 = vadd.f32 %v369_v29, %v273_v27  ;;  %v466_v33 = vadd.f32 %v370_v31, %v274_v30  ;;  %v275_v34 = vld [vmem:[%s1144_s23 + $0x1b0] sm:$0xff]  ;;  %v276_v36 = vld [vmem:[%s1144_s23 + $0x1b8] sm:$0xff]  ;;  %v277_v39 = vld [vmem:[%s1144_s23 + $0x1c0] sm:$0xff] }
  0x85   : > { %v371_v35 = vld [vmem:[#allocation5 + $0x1b0] sm:$0xff]  ;;  %560 = vst [vmem:[%s1159_s17 + $0x198] sm:$0xff] %v464_v28  ;;  %v372_v38 = vld [vmem:[#allocation5 + $0x1b8] sm:$0xff]  ;;  %v373_v40 = vld [vmem:[#allocation5 + $0x1c0] sm:$0xff] }
  0x86   : > { %v467_v37 = vadd.f32 %v371_v35, %v275_v34  ;;  %561 = vst [vmem:[%s1159_s17 + $0x1a0] sm:$0xff] %v465_v32  ;;  %562 = vst [vmem:[%s1159_s17 + $0x1a8] sm:$0xff] %v466_v33  ;;  %v468_v41 = vadd.f32 %v372_v38, %v276_v36  ;;  %v469_v42 = vadd.f32 %v373_v40, %v277_v39  ;;  %v278_v43 = vld [vmem:[%s1144_s23 + $0x1c8] sm:$0xff]  ;;  %v279_v45 = vld [vmem:[%s1144_s23 + $0x1d0] sm:$0xff] }
  0x87   : > { %v374_v44 = vld [vmem:[#allocation5 + $0x1c8] sm:$0xff]  ;;  %v375_v47 = vld [vmem:[#allocation5 + $0x1d0] sm:$0xff]  ;;  %v280_v48 = vld [vmem:[%s1144_s23 + $0x1d8] sm:$0xff] }
  0x88   : > { %563 = vst [vmem:[%s1159_s17 + $0x1b0] sm:$0xff] %v467_v37  ;;  %v470_v46 = vadd.f32 %v374_v44, %v278_v43  ;;  %v376_v49 = vld [vmem:[#allocation5 + $0x1d8] sm:$0xff]  ;;  %564 = vst [vmem:[%s1159_s17 + $0x1b8] sm:$0xff] %v468_v41  ;;  %v471_v50 = vadd.f32 %v375_v47, %v279_v45  ;;  %v281_v52 = vld [vmem:[%s1144_s23 + $0x1e0] sm:$0xff] }
  0x89   : > { %565 = vst [vmem:[%s1159_s17 + $0x1c0] sm:$0xff] %v469_v42  ;;  %v472_v51 = vadd.f32 %v376_v49, %v280_v48  ;;  %v377_v53 = vld [vmem:[#allocation5 + $0x1e0] sm:$0xff]  ;;  %v282_v54 = vld [vmem:[%s1144_s23 + $0x1e8] sm:$0xff]  ;;  %v283_v57 = vld [vmem:[%s1144_s23 + $0x1f0] sm:$0xff] }
  0x8a   : > { %566 = vst [vmem:[%s1159_s17 + $0x1c8] sm:$0xff] %v470_v46  ;;  %v473_v55 = vadd.f32 %v377_v53, %v281_v52  ;;  %v378_v56 = vld [vmem:[#allocation5 + $0x1e8] sm:$0xff]  ;;  %v379_v58 = vld [vmem:[#allocation5 + $0x1f0] sm:$0xff]  ;;  %567 = vst [vmem:[%s1159_s17 + $0x1d0] sm:$0xff] %v471_v50 }
  0x8b   : > { %568 = vst [vmem:[%s1159_s17 + $0x1d8] sm:$0xff] %v472_v51  ;;  %v474_v59 = vadd.f32 %v378_v56, %v282_v54  ;;  %v475_v60 = vadd.f32 %v379_v58, %v283_v57  ;;  %v284_v61 = vld [vmem:[%s1144_s23 + $0x1f8] sm:$0xff]  ;;  %v285_v63 = vld [vmem:[%s1144_s23 + $0x200] sm:$0xff]  ;;  %v286_v2 = vld [vmem:[%s1144_s23 + $0x208] sm:$0xff] }
  0x8c   : > { %v380_v62 = vld [vmem:[#allocation5 + $0x1f8] sm:$0xff]  ;;  %569 = vst [vmem:[%s1159_s17 + $0x1e0] sm:$0xff] %v473_v55  ;;  %v381_v1 = vld [vmem:[#allocation5 + $0x200] sm:$0xff]  ;;  %v382_v3 = vld [vmem:[#allocation5 + $0x208] sm:$0xff] }
  0x8d   : > { %v476_v0 = vadd.f32 %v380_v62, %v284_v61  ;;  %570 = vst [vmem:[%s1159_s17 + $0x1e8] sm:$0xff] %v474_v59  ;;  %571 = vst [vmem:[%s1159_s17 + $0x1f0] sm:$0xff] %v475_v60  ;;  %v477_v4 = vadd.f32 %v381_v1, %v285_v63  ;;  %v478_v5 = vadd.f32 %v382_v3, %v286_v2  ;;  %v287_v6 = vld [vmem:[%s1144_s23 + $0x210] sm:$0xff]  ;;  %v288_v8 = vld [vmem:[%s1144_s23 + $0x218] sm:$0xff] }
  0x8e   : > { %v383_v7 = vld [vmem:[#allocation5 + $0x210] sm:$0xff]  ;;  %v384_v10 = vld [vmem:[#allocation5 + $0x218] sm:$0xff]  ;;  %v289_v11 = vld [vmem:[%s1144_s23 + $0x220] sm:$0xff] }
  0x8f   : > { %572 = vst [vmem:[%s1159_s17 + $0x1f8] sm:$0xff] %v476_v0  ;;  %v479_v9 = vadd.f32 %v383_v7, %v287_v6  ;;  %v385_v12 = vld [vmem:[#allocation5 + $0x220] sm:$0xff]  ;;  %573 = vst [vmem:[%s1159_s17 + $0x200] sm:$0xff] %v477_v4  ;;  %v480_v13 = vadd.f32 %v384_v10, %v288_v8  ;;  %v290_v15 = vld [vmem:[%s1144_s23 + $0x228] sm:$0xff] }
  0x90   : > { %574 = vst [vmem:[%s1159_s17 + $0x208] sm:$0xff] %v478_v5  ;;  %v481_v14 = vadd.f32 %v385_v12, %v289_v11  ;;  %v386_v16 = vld [vmem:[#allocation5 + $0x228] sm:$0xff]  ;;  %v291_v17 = vld [vmem:[%s1144_s23 + $0x230] sm:$0xff]  ;;  %v292_v20 = vld [vmem:[%s1144_s23 + $0x238] sm:$0xff] }
  0x91   : > { %575 = vst [vmem:[%s1159_s17 + $0x210] sm:$0xff] %v479_v9  ;;  %v482_v18 = vadd.f32 %v386_v16, %v290_v15  ;;  %v387_v19 = vld [vmem:[#allocation5 + $0x230] sm:$0xff]  ;;  %v388_v21 = vld [vmem:[#allocation5 + $0x238] sm:$0xff]  ;;  %576 = vst [vmem:[%s1159_s17 + $0x218] sm:$0xff] %v480_v13 }
  0x92   : > { %577 = vst [vmem:[%s1159_s17 + $0x220] sm:$0xff] %v481_v14  ;;  %v483_v22 = vadd.f32 %v387_v19, %v291_v17  ;;  %v484_v23 = vadd.f32 %v388_v21, %v292_v20  ;;  %v293_v24 = vld [vmem:[%s1144_s23 + $0x240] sm:$0xff]  ;;  %v294_v26 = vld [vmem:[%s1144_s23 + $0x248] sm:$0xff]  ;;  %v295_v29 = vld [vmem:[%s1144_s23 + $0x250] sm:$0xff] }
  0x93   : > { %v389_v25 = vld [vmem:[#allocation5 + $0x240] sm:$0xff]  ;;  %578 = vst [vmem:[%s1159_s17 + $0x228] sm:$0xff] %v482_v18  ;;  %v390_v28 = vld [vmem:[#allocation5 + $0x248] sm:$0xff]  ;;  %v391_v30 = vld [vmem:[#allocation5 + $0x250] sm:$0xff] }
  0x94   : > { %v485_v27 = vadd.f32 %v389_v25, %v293_v24  ;;  %579 = vst [vmem:[%s1159_s17 + $0x230] sm:$0xff] %v483_v22  ;;  %580 = vst [vmem:[%s1159_s17 + $0x238] sm:$0xff] %v484_v23  ;;  %v486_v31 = vadd.f32 %v390_v28, %v294_v26  ;;  %v487_v32 = vadd.f32 %v391_v30, %v295_v29  ;;  %v296_v33 = vld [vmem:[%s1144_s23 + $0x258] sm:$0xff]  ;;  %v297_v35 = vld [vmem:[%s1144_s23 + $0x260] sm:$0xff] }
  0x95   : > { %v392_v34 = vld [vmem:[#allocation5 + $0x258] sm:$0xff]  ;;  %v393_v37 = vld [vmem:[#allocation5 + $0x260] sm:$0xff]  ;;  %v298_v38 = vld [vmem:[%s1144_s23 + $0x268] sm:$0xff] }
  0x96   : > { %581 = vst [vmem:[%s1159_s17 + $0x240] sm:$0xff] %v485_v27  ;;  %v488_v36 = vadd.f32 %v392_v34, %v296_v33  ;;  %v394_v39 = vld [vmem:[#allocation5 + $0x268] sm:$0xff]  ;;  %582 = vst [vmem:[%s1159_s17 + $0x248] sm:$0xff] %v486_v31  ;;  %v489_v40 = vadd.f32 %v393_v37, %v297_v35  ;;  %v299_v42 = vld [vmem:[%s1144_s23 + $0x270] sm:$0xff] }
  0x97   : > { %583 = vst [vmem:[%s1159_s17 + $0x250] sm:$0xff] %v487_v32  ;;  %v490_v41 = vadd.f32 %v394_v39, %v298_v38  ;;  %v395_v43 = vld [vmem:[#allocation5 + $0x270] sm:$0xff]  ;;  %v300_v44 = vld [vmem:[%s1144_s23 + $0x278] sm:$0xff]  ;;  %v301_v47 = vld [vmem:[%s1144_s23 + $0x280] sm:$0xff] }
  0x98   : > { %584 = vst [vmem:[%s1159_s17 + $0x258] sm:$0xff] %v488_v36  ;;  %v491_v45 = vadd.f32 %v395_v43, %v299_v42  ;;  %v396_v46 = vld [vmem:[#allocation5 + $0x278] sm:$0xff]  ;;  %v397_v48 = vld [vmem:[#allocation5 + $0x280] sm:$0xff]  ;;  %585 = vst [vmem:[%s1159_s17 + $0x260] sm:$0xff] %v489_v40 }
  0x99   : > { %586 = vst [vmem:[%s1159_s17 + $0x268] sm:$0xff] %v490_v41  ;;  %v492_v49 = vadd.f32 %v396_v46, %v300_v44  ;;  %v493_v50 = vadd.f32 %v397_v48, %v301_v47  ;;  %v302_v51 = vld [vmem:[%s1144_s23 + $0x288] sm:$0xff]  ;;  %v303_v53 = vld [vmem:[%s1144_s23 + $0x290] sm:$0xff]  ;;  %v304_v56 = vld [vmem:[%s1144_s23 + $0x298] sm:$0xff] }
  0x9a   : > { %v398_v52 = vld [vmem:[#allocation5 + $0x288] sm:$0xff]  ;;  %587 = vst [vmem:[%s1159_s17 + $0x270] sm:$0xff] %v491_v45  ;;  %v399_v55 = vld [vmem:[#allocation5 + $0x290] sm:$0xff]  ;;  %v400_v57 = vld [vmem:[#allocation5 + $0x298] sm:$0xff] }
  0x9b   : > { %v494_v54 = vadd.f32 %v398_v52, %v302_v51  ;;  %588 = vst [vmem:[%s1159_s17 + $0x278] sm:$0xff] %v492_v49  ;;  %589 = vst [vmem:[%s1159_s17 + $0x280] sm:$0xff] %v493_v50  ;;  %v495_v58 = vadd.f32 %v399_v55, %v303_v53  ;;  %v496_v59 = vadd.f32 %v400_v57, %v304_v56  ;;  %v305_v60 = vld [vmem:[%s1144_s23 + $0x2a0] sm:$0xff]  ;;  %v306_v62 = vld [vmem:[%s1144_s23 + $0x2a8] sm:$0xff] }
  0x9c   : > { %v401_v61 = vld [vmem:[#allocation5 + $0x2a0] sm:$0xff]  ;;  %v402_v0 = vld [vmem:[#allocation5 + $0x2a8] sm:$0xff]  ;;  %v307_v1 = vld [vmem:[%s1144_s23 + $0x2b0] sm:$0xff] }
  0x9d   : > { %590 = vst [vmem:[%s1159_s17 + $0x288] sm:$0xff] %v494_v54  ;;  %v497_v63 = vadd.f32 %v401_v61, %v305_v60  ;;  %v403_v2 = vld [vmem:[#allocation5 + $0x2b0] sm:$0xff]  ;;  %591 = vst [vmem:[%s1159_s17 + $0x290] sm:$0xff] %v495_v58  ;;  %v498_v3 = vadd.f32 %v402_v0, %v306_v62  ;;  %v308_v5 = vld [vmem:[%s1144_s23 + $0x2b8] sm:$0xff] }
  0x9e   : > { %592 = vst [vmem:[%s1159_s17 + $0x298] sm:$0xff] %v496_v59  ;;  %v499_v4 = vadd.f32 %v403_v2, %v307_v1  ;;  %v404_v6 = vld [vmem:[#allocation5 + $0x2b8] sm:$0xff]  ;;  %v309_v7 = vld [vmem:[%s1144_s23 + $0x2c0] sm:$0xff]  ;;  %v310_v10 = vld [vmem:[%s1144_s23 + $0x2c8] sm:$0xff] }
  0x9f   : > { %593 = vst [vmem:[%s1159_s17 + $0x2a0] sm:$0xff] %v497_v63  ;;  %v500_v8 = vadd.f32 %v404_v6, %v308_v5  ;;  %v405_v9 = vld [vmem:[#allocation5 + $0x2c0] sm:$0xff]  ;;  %v406_v11 = vld [vmem:[#allocation5 + $0x2c8] sm:$0xff]  ;;  %594 = vst [vmem:[%s1159_s17 + $0x2a8] sm:$0xff] %v498_v3 }
  0xa0   : > { %595 = vst [vmem:[%s1159_s17 + $0x2b0] sm:$0xff] %v499_v4  ;;  %v501_v12 = vadd.f32 %v405_v9, %v309_v7  ;;  %v502_v13 = vadd.f32 %v406_v11, %v310_v10  ;;  %v311_v14 = vld [vmem:[%s1144_s23 + $0x2d0] sm:$0xff]  ;;  %v312_v16 = vld [vmem:[%s1144_s23 + $0x2d8] sm:$0xff]  ;;  %v313_v19 = vld [vmem:[%s1144_s23 + $0x2e0] sm:$0xff] }
  0xa1   : > { %v407_v15 = vld [vmem:[#allocation5 + $0x2d0] sm:$0xff]  ;;  %596 = vst [vmem:[%s1159_s17 + $0x2b8] sm:$0xff] %v500_v8  ;;  %v408_v18 = vld [vmem:[#allocation5 + $0x2d8] sm:$0xff]  ;;  %v409_v20 = vld [vmem:[#allocation5 + $0x2e0] sm:$0xff] }
  0xa2   : > { %v503_v17 = vadd.f32 %v407_v15, %v311_v14  ;;  %597 = vst [vmem:[%s1159_s17 + $0x2c0] sm:$0xff] %v501_v12  ;;  %598 = vst [vmem:[%s1159_s17 + $0x2c8] sm:$0xff] %v502_v13  ;;  %v504_v21 = vadd.f32 %v408_v18, %v312_v16  ;;  %v505_v22 = vadd.f32 %v409_v20, %v313_v19  ;;  %v314_v23 = vld [vmem:[%s1144_s23 + $0x2e8] sm:$0xff]  ;;  %v315_v25 = vld [vmem:[%s1144_s23 + $0x2f0] sm:$0xff] }
  0xa3   : > { %v410_v24 = vld [vmem:[#allocation5 + $0x2e8] sm:$0xff]  ;;  %v411_v27 = vld [vmem:[#allocation5 + $0x2f0] sm:$0xff]  ;;  %v316_v28 = vld [vmem:[%s1144_s23 + $0x2f8] sm:$0xff] }
  0xa4   : > { %599 = vst [vmem:[%s1159_s17 + $0x2d0] sm:$0xff] %v503_v17  ;;  %v506_v26 = vadd.f32 %v410_v24, %v314_v23  ;;  %v412_v29 = vld [vmem:[#allocation5 + $0x2f8] sm:$0xff]  ;;  %600 = vst [vmem:[%s1159_s17 + $0x2d8] sm:$0xff] %v504_v21  ;;  %v507_v30 = vadd.f32 %v411_v27, %v315_v25 }
  0xa5   : > { %601 = vst [vmem:[%s1159_s17 + $0x2e0] sm:$0xff] %v505_v22  ;;  %v508_v31 = vadd.f32 %v412_v29, %v316_v28 }
  0xa6   : > { %602 = vst [vmem:[%s1159_s17 + $0x2e8] sm:$0xff] %v506_v26  ;;  %603 = vst [vmem:[%s1159_s17 + $0x2f0] sm:$0xff] %v507_v30 }
  0xa7   : > { %604 = vst [vmem:[%s1159_s17 + $0x2f8] sm:$0xff] %v508_v31 }
  0xa8   : > { %891 = shalt.err (!%p888_p5)
}
  0xa9   : > { %s892_s26 = scalar_lea.hbm %s1352_s7, 12288  ;;  %s896_s16 = scalar_lea.hbm %s1406_s2, 24576 }
  0xaa   : > { %p893_p9 = scmp.ne.s32.totalorder %s1352_s7, %s892_s26  ;;  %p897_p3 = scmp.lt.u32.totalorder %s1352_s7, %s1406_s2 }
  0xab   : > { %p898_p7 = scmp.lt.u32.totalorder %s896_s16, %s892_s26  ;;  %p900_p4 = scmp.lt.u32.totalorder %s892_s26, %s1352_s7 }
  0xac   : > { %p894_p1 = pnand %p893_p9, %p1083_p10 }
  0xad   : > { %p899_p11 = por %p898_p7, %p897_p3 }
  0xae   : > { %p895_p2 = pneg %p894_p1 }
  0xaf   : > { %p901_p6 = por %p900_p4, %p899_p11 }
  0xb1   : > { %p902_p8 = pnand %p901_p6, %p895_p2 }
  0xb3   : > { %905 = shalt.err (!%p902_p8)
}
  0xb4   : > { %s971_s23 = smov 128   ;;  %s972_s17 = smov 8  }
  0xb5   : > { %749 = dma.vmem_to_hbm [thread:$0]  (%p1083_p10), %s1345_s21, 12288, %s1352_s7, %s606_s30, %s971_s23, %s971_s23, %s972_s17  }
  0xb6 PF: > { %s637_s19 = sand.u32 1, %s944_s9   ;;  %p1423_p12 = scmp.ne.s32.totalorder %s1414_s20, 0 }
  0xb7   : > { %p1424_p13 = scmp.ge.s32.totalorder %s964_s14, 2  ;;  %s638_s12 = scalar_lea.sflag [#allocation4], %s637_s19 }
  0xb9   : > { %p760_p0 = pnand %p1424_p13, %p1423_p12 }
  0xbb   : > { %939 = dma.done.wait (!%p760_p0), %s638_s12, 12288  }
  0xbc   : > { %941 = vsyncadd (!%p760_p0), %s638_s12, 4294955008  ;;  %s19_s14 = sadd.s32 1, %s964_s14   ;;  %s1425_s9 = smov %s948_s10 }
  0xbd   : > { %p16_p5 = scmp.ge.s32.totalorder %s19_s14, 4   ;;  %s1426_s10 = smov %s952_s11 }
  0xbe   : > { %s1427_s11 = smov %s1092_s28  ;;  %s1428_s12 = smov %s960_s13 }
  0xbf   : > { %s1429_s13 = smov %s1431_s25  ;;  %18 = sbr.rel (!%p16_p5) target bundleno = 7 (0x7), region = 78 }
  0xc6   :  { %643 = vsyncpa [#allocation3], 1 }
  0xc7   :  { %645 = vsyncpa [#allocation3 + $0x1], 1 }
  0xc8   :  { %646 = vsyncpa [#allocation6], 1 }
  0xc9   :  { %647 = vsyncpa [#allocation4], 1 }
  0xca   :  { %649 = vsyncpa [#allocation4 + $0x1], 1 }

</bundles_post_ra>
